<compile_context>
chip_gen: v5e
topology: v5e:2x2
jax: 0.10.0
libtpu: 0.0.40
codegen_flags: <defaults>
</compile_context>

<pallas_src>
import functools

import jax
import jax.numpy as jnp
from jax.experimental import pallas as pl
from jax.experimental.pallas import tpu as pltpu


_TIME_TILE = 256  # target rows per time tile (M of the conv matmuls)


def _pick_time_tile(tq_full):
    """Largest multiple-of-16 tile <= _TIME_TILE that divides Tq (else full length)."""
    if tq_full <= _TIME_TILE:
        return tq_full
    t = _TIME_TILE - (_TIME_TILE % 16)
    while t >= 16:
        if tq_full % t == 0:
            return t
        t -= 16
    return tq_full


# ----------------------------- in-kernel helpers -----------------------------

def _erf(x):
    # Abramowitz & Stegun 7.1.26 rational approximation (|err| < 1.5e-7), built only
    # from mul/add/exp/reciprocal/where so it is guaranteed to lower on Mosaic.
    a1, a2, a3, a4, a5 = 0.254829592, -0.284496736, 1.421413741, -1.453152027, 1.061405429
    p = 0.3275911
    sign = jnp.where(x < 0.0, -1.0, 1.0)
    ax = jnp.abs(x)
    t = pl.reciprocal(1.0 + p * ax, approx=True)   # EUP vrcp instead of a VALU divide
    poly = ((((a5 * t + a4) * t + a3) * t + a2) * t + a1) * t
    return sign * (1.0 - poly * jnp.exp(-ax * ax))


def _gelu(x):
    # exact (erf-based) GELU, matching torch.nn.functional.gelu's default.
    return 0.5 * x * (1.0 + _erf(x * 0.7071067811865476))


def _mm(x, w):
    # 2-D matmul on the MXU: bf16 operands, f32 accumulation (weights pre-cast to bf16).
    return jnp.dot(x.astype(jnp.bfloat16), w, preferred_element_type=jnp.float32)


# ------------------------------- Pallas kernel -------------------------------

def udecoder_layer_kernel(qw_ref, kv_ref, whalo_ref, *rest,
                          alpha, n_head, c_k, first, final):
    """One (batch, time-tile) block of a UDecoder layer.

    Ref shapes (batch squeezed):
      qw_ref    : (tq, c_k + Cw)   time-major block of [q | w]
      kv_ref    : (c_k + Cv, Tk)   full keys/values, NCW layout (lane-dense on Tk)
      whalo_ref : (2, Cw)          w rows feeding the conv halo (reflect resolved in wrapper)
      rsp_ref   : (tq//2, c_h)     previous layer's residual tile        (not first)
      rsph_ref  : (2, c_h)         previous residual at the halo rows    (not first)
      weights   : w_in (Cw,c_h)  w3 (3c_h,c_h)  w_cond (H,dv,c_h)  w1 (c_h,c_h)   [bf16]
                  biases (1,c_h) [f32];  final adds w_out (c_h,c_out), b_out (1,c_out)
      out_ref   : (tq, c_h)  or (tq, c_out) when final
    """
    if first:
        (w_in_ref, b_in_ref, w3_ref, b3_ref, wc_ref, bc_ref,
         w1_ref, b1_ref, *tail) = rest
        rsp_ref = rsph_ref = None
    else:
        (rsp_ref, rsph_ref, w_in_ref, b_in_ref, w3_ref, b3_ref, wc_ref, bc_ref,
         w1_ref, b1_ref, *tail) = rest
    if final:
        w_out_ref, b_out_ref, out_ref = tail
    else:
        (out_ref,) = tail

    f32 = jnp.float32
    bf16 = jnp.bfloat16

    qw = qw_ref[...]                  # (tq, c_k + Cw)
    kv = kv_ref[...]                  # (c_k + Cv, Tk)
    w_in = w_in_ref[...]
    wc = wc_ref[...]                  # (H, dv, c_h)

    tq = qw.shape[0]
    c_h = w1_ref.shape[0]
    H = n_head
    dk = c_k // H
    dv = wc.shape[1]

    # ---------- attention -> conditioning (cosine softmax, alpha folded into q) ----------
    q = qw[:, :c_k]                                           # (tq, c_k) time-major
    cond = jnp.zeros((tq, c_h), f32)
    for h in range(H):
        q_h = q[:, h * dk:(h + 1) * dk]                       # (tq, dk)
        k_h = kv[h * dk:(h + 1) * dk, :]                      # (dk, Tk)
        v_h = kv[c_k + h * dv:c_k + (h + 1) * dv, :]          # (dv, Tk)
        # F.normalize over the per-head channel dim (eps=1e-12); fold alpha into q.
        qn = q_h * (alpha * jax.lax.rsqrt(
            jnp.maximum(jnp.sum(q_h * q_h, axis=-1, keepdims=True), 1e-24)))
        kn = k_h * jax.lax.rsqrt(
            jnp.maximum(jnp.sum(k_h * k_h, axis=0, keepdims=True), 1e-24))
        logits = jnp.dot(qn.astype(bf16), kn.astype(bf16),
                         preferred_element_type=f32)          # (tq, Tk)
        # Cosine-normalized logits are bounded by |alpha| (=5): exp cannot overflow,
        # so no max-subtraction is needed.  (Do NOT reuse with unnormalized logits.)
        e = jnp.exp(logits)
        sm = e * pl.reciprocal(jnp.sum(e, axis=-1, keepdims=True))  # exact: rows sum to 1
        z_h = jnp.einsum('qk,dk->qd', sm.astype(bf16), v_h.astype(bf16),
                         preferred_element_type=f32)          # (tq, dv)
        cond = cond + _mm(z_h, wc[h])                         # conds[n] per head, no concat
    cond = cond + bc_ref[...]

    # ------- input 1x1 conv (+ fused nearest-2x upsample of the previous residual) -------
    w = qw[:, c_k:]                                           # (tq, Cw)
    rs = _mm(w, w_in) + b_in_ref[...]                         # (tq, c_h)
    halo = _mm(whalo_ref[...], w_in) + b_in_ref[...]          # (2, c_h): rs at the halo rows
    if not first:
        rsp = rsp_ref[...]                                    # (tq//2, c_h)
        tp = rsp.shape[0]
        up = jnp.broadcast_to(rsp[:, None, :], (tp, 2, c_h)).reshape(tq, c_h)
        rs = rs + up
        halo = halo + rsph_ref[...]

    # ------- reflect-pad + kernel-3 conv fused into one K=3*c_h matmul -------
    rs_m1 = jnp.concatenate([halo[0:1, :], rs[:-1, :]], axis=0)   # rs[t-1]
    rs_p1 = jnp.concatenate([rs[1:, :], halo[1:2, :]], axis=0)    # rs[t+1]
    taps = jnp.concatenate([rs_m1, rs, rs_p1], axis=-1)           # (tq, 3*c_h)
    skip = _gelu(_mm(taps, w3_ref[...]) + b3_ref[...])

    # ------- + conditioning, 1x1 conv, gated residual -------
    skip = skip + cond
    skip = _mm(skip, w1_ref[...]) + b1_ref[...]
    rs = rs + _gelu(skip)

    if final:
        # fused output 1x1 conv (no separate pallas_call / extra HBM pass of rs)
        out_ref[...] = _mm(rs, w_out_ref[...]) + b_out_ref[...]
    else:
        out_ref[...] = rs


# ------------------------------- glue / wrapper -------------------------------

def run_layer(qw_t, kv, w_halo, rs_prev, rsp_halo, lp, *,
              alpha, n_head, c_k, first, final, tq, out_w=None, out_b=None):
    B, Tq, CqW = qw_t.shape
    NT = Tq // tq
    Ckv, Tk = kv.shape[1], kv.shape[2]
    c_h = lp['w1'].shape[0]
    Cw = w_halo.shape[-1]

    def const_spec(a):
        n = a.ndim
        # constant block index -> fetched once; single-buffered (no pointless double buffer)
        return pl.BlockSpec(a.shape, lambda b, i: (0,) * n,
                            pipeline_mode=pl.Buffered(1))

    in_specs = [
        pl.BlockSpec((None, tq, CqW), lambda b, i: (b, i, 0)),          # [q|w] time tile
        pl.BlockSpec((None, Ckv, Tk), lambda b, i: (b, 0, 0)),          # full keys/values (NCW)
        pl.BlockSpec((None, None, 2, Cw), lambda b, i: (b, i, 0, 0)),   # conv halo rows of w
    ]
    args = [qw_t, kv, w_halo]
    if not first:
        in_specs += [
            pl.BlockSpec((None, tq // 2, c_h), lambda b, i: (b, i, 0)),     # rs_prev tile
            pl.BlockSpec((None, None, 2, c_h), lambda b, i: (b, i, 0, 0)),  # rs_prev halo rows
        ]
        args += [rs_prev, rsp_halo]

    weights = [lp['w_in'], lp['b_in'], lp['w3'], lp['b3'],
               lp['w_cond'], lp['b_cond'], lp['w1'], lp['b1']]
    if final:
        weights += [out_w, out_b]
    in_specs += [const_spec(x) for x in weights]
    args += weights

    c_last = out_w.shape[-1] if final else c_h
    out_shape = jax.ShapeDtypeStruct((B, Tq, c_last), jnp.float32)
    out_spec = pl.BlockSpec((None, tq, c_last), lambda b, i: (b, i, 0))

    kern = functools.partial(udecoder_layer_kernel, alpha=alpha, n_head=n_head,
                             c_k=c_k, first=first, final=final)
    return pl.pallas_call(
        kern,
        out_shape=out_shape,
        grid=(B, NT),
        in_specs=in_specs,
        out_specs=out_spec,
        compiler_params=pltpu.CompilerParams(
            dimension_semantics=("parallel", "parallel"),
            vmem_limit_bytes=48 * 1024 * 1024),
    )(*args)


def udecoder_forward(params, qws, kvs, cfg, use_w=False):
    L = cfg['n_layers']
    c_k, c_h = cfg['c_k'], cfg['c_h']
    H = cfg['n_head']
    alpha = cfg['attention_alpha']

    rs = None
    ws = []
    for n in range(L):
        qw = qws[n]                                   # (B, c_k + Cw, Tq)  NCW
        kv = kvs[n]                                   # (B, c_k + Cv, Tk)  NCW (DMA'd as-is)
        B, CqW, Tq = qw.shape
        Cw = CqW - c_k
        ws.append(qw[:, c_k:, :])

        qw_t = jnp.transpose(qw, (0, 2, 1))           # (B, Tq, c_k + Cw)  time-major for q/w
        tq = _pick_time_tile(Tq)
        NT = Tq // tq

        # boundary source rows per tile for the k=3 conv (reflect padding resolved here)
        rows = []
        for i in range(NT):
            left = 1 if i == 0 else i * tq - 1
            right = Tq - 2 if i == NT - 1 else (i + 1) * tq
            rows.append([left, right])
        halo_rows = jnp.asarray(rows, dtype=jnp.int32)                 # (NT, 2)
        w_halo = jnp.take(qw_t[:, :, c_k:], halo_rows.reshape(-1),
                          axis=1).reshape(B, NT, 2, Cw)

        first, final = (n == 0), (n == L - 1)
        if first:
            rs_prev = rsp_halo = None
        else:
            rs_prev = rs                                               # (B, Tq//2, c_h)
            rsp_halo = jnp.take(rs_prev, (halo_rows // 2).reshape(-1),
                                axis=1).reshape(B, NT, 2, c_h)

        rs = run_layer(qw_t, kv, w_halo, rs_prev, rsp_halo, params['layers'][n],
                       alpha=alpha, n_head=H, c_k=c_k, first=first, final=final, tq=tq,
                       out_w=params['out_w'] if final else None,
                       out_b=params['out_b'] if final else None)

    out = jnp.transpose(rs, (0, 2, 1))                # back to NCW: (B, c_out, T_final)
    if use_w:
        return out, ws
    return out


# ------------------------------- parameter init -------------------------------

def _init_conv1d(key, c_out, c_in, ksize):
    # xavier_uniform (gain('linear') == 1.0) weight + default torch Conv1d bias init.
    kw, kb = jax.random.split(key)
    wb = (6.0 / (c_in * ksize + c_out * ksize)) ** 0.5
    w = jax.random.uniform(kw, (c_out, c_in, ksize), jnp.float32, -wb, wb)
    bb = 1.0 / (c_in * ksize) ** 0.5
    b = jax.random.uniform(kb, (c_out,), jnp.float32, -bb, bb)
    return w, b


def build_params(key, cfg):
    L, c_h, H = cfg['n_layers'], cfg['c_h'], cfg['n_head']
    ks = jax.random.split(key, L + 1)
    bf16 = jnp.bfloat16
    layers = []
    for n in range(L):
        Cw = cfg['c_w'] * 2 ** (L - n - 1)
        Cv = cfg['c_z'] * 2 ** (L - n - 1)
        k_in, k_c3, k_c1, k_cd = jax.random.split(ks[n], 4)
        w_in, b_in = _init_conv1d(k_in, c_h, Cw, 1)       # inputs[n]
        w3, b3 = _init_conv1d(k_c3, c_h, c_h, 3)          # convs[2n]
        w1, b1 = _init_conv1d(k_c1, c_h, c_h, 1)          # convs[2n+1]
        wc, bc = _init_conv1d(k_cd, c_h, Cv, 1)           # conds[n]
        layers.append(dict(
            w_in=w_in[:, :, 0].T.astype(bf16), b_in=b_in[None, :],
            # (c_out, c_in, 3) -> (3*c_in, c_out): row j*c_in + c  <->  tap j, channel c
            w3=jnp.transpose(w3, (2, 1, 0)).reshape(3 * c_h, c_h).astype(bf16),
            b3=b3[None, :],
            # (c_h, Cv) -> (Cv, c_h) -> (H, dv, c_h): leading-dim head slicing in-kernel
            w_cond=wc[:, :, 0].T.reshape(H, Cv // H, c_h).astype(bf16),
            b_cond=bc[None, :],
            w1=w1[:, :, 0].T.astype(bf16), b1=b1[None, :],
        ))
    wo, bo = _init_conv1d(ks[-1], cfg['c_out'], c_h, 1)   # output conv
    return dict(layers=layers,
                out_w=wo[:, :, 0].T.astype(bf16), out_b=bo[None, :])


# ------------------------------------ main ------------------------------------

if __name__ == "__main__":
    # Small config consistent with the module (c_k and c_z*2**(L-n-1) divisible by n_head).
    cfg = dict(c_w=2, c_z=16, c_k=16, c_h=32, c_out=8, n_head=2,
               attention_alpha=5.0, n_layers=3)
    B, T0, Tk = 2, 8, 8
    L = cfg['n_layers']
    for n in range(L):
        assert cfg['c_k'] % cfg['n_head'] == 0
        assert (cfg['c_z'] * 2 ** (L - n - 1)) % cfg['n_head'] == 0

    key = jax.random.PRNGKey(0)
    pkey, dkey = jax.random.split(key)
    params = build_params(pkey, cfg)

    dks = jax.random.split(dkey, 2 * L)
    qws, kvs = [], []
    for n in range(L):
        Cw = cfg['c_w'] * 2 ** (L - n - 1)
        Cv = cfg['c_z'] * 2 ** (L - n - 1)
        Tq = T0 * 2 ** n
        qws.append(jax.random.normal(dks[2 * n], (B, cfg['c_k'] + Cw, Tq), jnp.float32))
        kvs.append(jax.random.normal(dks[2 * n + 1], (B, cfg['c_k'] + Cv, Tk), jnp.float32))

    out = udecoder_forward(params, qws, kvs, cfg)     # (B, c_out, T0 * 2**(L-1))
    jax.block_until_ready(out)
    assert out.shape == (B, cfg['c_out'], T0 * 2 ** (L - 1))
    print("KERNEL_OK")
</pallas_src>

<mosaic_0001>
module attributes {stable_mosaic.version = 11 : i64} {
  func.func @udecoder_layer_kernel(%arg0: i32, %arg1: i32, %arg2: memref<1x8x24xf32, #tpu.memory_space<vmem>>, %arg3: memref<1x80x8xf32, #tpu.memory_space<vmem>>, %arg4: memref<1x1x2x8xf32, #tpu.memory_space<vmem>>, %arg5: memref<8x32xbf16, #tpu.memory_space<vmem>>, %arg6: memref<1x32xf32, #tpu.memory_space<vmem>>, %arg7: memref<96x32xbf16, #tpu.memory_space<vmem>>, %arg8: memref<1x32xf32, #tpu.memory_space<vmem>>, %arg9: memref<2x32x32xbf16, #tpu.memory_space<vmem>>, %arg10: memref<1x32xf32, #tpu.memory_space<vmem>>, %arg11: memref<32x32xbf16, #tpu.memory_space<vmem>>, %arg12: memref<1x32xf32, #tpu.memory_space<vmem>>, %arg13: memref<1x8x32xf32, #tpu.memory_space<vmem>>) attributes {dimension_semantics = [#tpu.dimension_semantics<parallel>, #tpu.dimension_semantics<parallel>], iteration_bounds = array<i64: 2, 1>, scalar_prefetch = 0 : i64, scratch_operands = 0 : i64, tpu.core_type = #tpu.core_type<tc>, window_params = [{transform_indices = @transform_0, window_bounds = array<i64: 1, 8, 24>}, {transform_indices = @transform_1, window_bounds = array<i64: 1, 80, 8>}, {transform_indices = @transform_2, window_bounds = array<i64: 1, 1, 2, 8>}, {pipeline_mode = #tpu.pipeline_mode<synchronous>, transform_indices = @transform_3, window_bounds = array<i64: 8, 32>}, {pipeline_mode = #tpu.pipeline_mode<synchronous>, transform_indices = @transform_4, window_bounds = array<i64: 1, 32>}, {pipeline_mode = #tpu.pipeline_mode<synchronous>, transform_indices = @transform_5, window_bounds = array<i64: 96, 32>}, {pipeline_mode = #tpu.pipeline_mode<synchronous>, transform_indices = @transform_6, window_bounds = array<i64: 1, 32>}, {pipeline_mode = #tpu.pipeline_mode<synchronous>, transform_indices = @transform_7, window_bounds = array<i64: 2, 32, 32>}, {pipeline_mode = #tpu.pipeline_mode<synchronous>, transform_indices = @transform_8, window_bounds = array<i64: 1, 32>}, {pipeline_mode = #tpu.pipeline_mode<synchronous>, transform_indices = @transform_9, window_bounds = array<i64: 32, 32>}, {pipeline_mode = #tpu.pipeline_mode<synchronous>, transform_indices = @transform_10, window_bounds = array<i64: 1, 32>}, {transform_indices = @transform_11, window_bounds = array<i64: 1, 8, 32>}]} {
    %c0 = arith.constant 0 : index
    %c0_0 = arith.constant 0 : index
    %c0_1 = arith.constant 0 : index
    %0 = vector.load %arg2[%c0, %c0_0, %c0_1] : memref<1x8x24xf32, #tpu.memory_space<vmem>>, vector<1x8x24xf32>
    %1 = vector.shape_cast %0 : vector<1x8x24xf32> to vector<8x24xf32>
    %c0_2 = arith.constant 0 : index
    %c0_3 = arith.constant 0 : index
    %c0_4 = arith.constant 0 : index
    %2 = vector.load %arg3[%c0_2, %c0_3, %c0_4] : memref<1x80x8xf32, #tpu.memory_space<vmem>>, vector<1x80x8xf32>
    %3 = vector.shape_cast %2 : vector<1x80x8xf32> to vector<80x8xf32>
    %c0_5 = arith.constant 0 : index
    %c0_6 = arith.constant 0 : index
    %4 = vector.load %arg5[%c0_5, %c0_6] : memref<8x32xbf16, #tpu.memory_space<vmem>>, vector<8x32xbf16>
    %c0_7 = arith.constant 0 : index
    %c0_8 = arith.constant 0 : index
    %c0_9 = arith.constant 0 : index
    %5 = vector.load %arg9[%c0_7, %c0_8, %c0_9] : memref<2x32x32xbf16, #tpu.memory_space<vmem>>, vector<2x32x32xbf16>
    %6 = vector.extract_strided_slice %1 {offsets = [0, 0], sizes = [8, 16], strides = [1, 1]} : vector<8x24xf32> to vector<8x16xf32>
    %cst = arith.constant 0.000000e+00 : f32
    %7 = vector.broadcast %cst : f32 to vector<8x32xf32>
    %8 = vector.extract_strided_slice %6 {offsets = [0, 0], sizes = [8, 8], strides = [1, 1]} : vector<8x16xf32> to vector<8x8xf32>
    %9 = vector.extract_strided_slice %3 {offsets = [0, 0], sizes = [8, 8], strides = [1, 1]} : vector<80x8xf32> to vector<8x8xf32>
    %10 = vector.extract_strided_slice %3 {offsets = [16, 0], sizes = [32, 8], strides = [1, 1]} : vector<80x8xf32> to vector<32x8xf32>
    %11 = arith.mulf %8, %8 : vector<8x8xf32>
    %cst_10 = arith.constant dense<0.000000e+00> : vector<8xf32>
    %12 = vector.multi_reduction <add>, %11, %cst_10 [1] : vector<8x8xf32> to vector<8xf32>
    %13 = vector.shape_cast %12 : vector<8xf32> to vector<8x1xf32>
    %cst_11 = arith.constant 1.000000e-24 : f32
    %14 = vector.broadcast %cst_11 : f32 to vector<8x1xf32>
    %15 = arith.maximumf %13, %14 : vector<8x1xf32>
    %16 = math.rsqrt %15 : vector<8x1xf32>
    %cst_12 = arith.constant 5.000000e+00 : f32
    %17 = vector.broadcast %cst_12 : f32 to vector<8x1xf32>
    %18 = arith.mulf %17, %16 : vector<8x1xf32>
    %19 = vector.broadcast %18 : vector<8x1xf32> to vector<8x8xf32>
    %20 = arith.mulf %8, %19 : vector<8x8xf32>
    %21 = arith.mulf %9, %9 : vector<8x8xf32>
    %cst_13 = arith.constant dense<0.000000e+00> : vector<8xf32>
    %22 = vector.multi_reduction <add>, %21, %cst_13 [0] : vector<8x8xf32> to vector<8xf32>
    %23 = vector.shape_cast %22 : vector<8xf32> to vector<1x8xf32>
    %cst_14 = arith.constant 1.000000e-24 : f32
    %24 = vector.broadcast %cst_14 : f32 to vector<1x8xf32>
    %25 = arith.maximumf %23, %24 : vector<1x8xf32>
    %26 = math.rsqrt %25 : vector<1x8xf32>
    %27 = vector.broadcast %26 : vector<1x8xf32> to vector<8x8xf32>
    %28 = arith.mulf %9, %27 : vector<8x8xf32>
    %29 = arith.truncf %20 : vector<8x8xf32> to vector<8x8xbf16>
    %30 = arith.truncf %28 : vector<8x8xf32> to vector<8x8xbf16>
    %cst_15 = arith.constant dense<0.000000e+00> : vector<8x8xf32>
    %31 = tpu.matmul %29, %30, %cst_15 {dimension_numbers = #tpu.dot_dimension_numbers<[1], [0], [0], [1], [0, 0, 1, 1], [], []>} : vector<8x8xbf16>, vector<8x8xbf16>, vector<8x8xf32> -> vector<8x8xf32>
    %32 = math.exp %31 : vector<8x8xf32>
    %cst_16 = arith.constant dense<0.000000e+00> : vector<8xf32>
    %33 = vector.multi_reduction <add>, %32, %cst_16 [1] : vector<8x8xf32> to vector<8xf32>
    %34 = vector.shape_cast %33 : vector<8xf32> to vector<8x1xf32>
    %35 = tpu.reciprocal %34 : vector<8x1xf32> -> vector<8x1xf32>
    %36 = vector.broadcast %35 : vector<8x1xf32> to vector<8x8xf32>
    %37 = arith.mulf %32, %36 : vector<8x8xf32>
    %38 = arith.truncf %37 : vector<8x8xf32> to vector<8x8xbf16>
    %39 = arith.truncf %10 : vector<32x8xf32> to vector<32x8xbf16>
    "tpu.trace_start"() <{level = 10 : i32, message = "qk,dk->qd"}> : () -> ()
    %cst_17 = arith.constant dense<0.000000e+00> : vector<8x32xf32>
    %40 = tpu.matmul %38, %39, %cst_17 {dimension_numbers = #tpu.dot_dimension_numbers<[1], [1], [0], [0], [0, 0, 1, 0], [], []>} : vector<8x8xbf16>, vector<32x8xbf16>, vector<8x32xf32> -> vector<8x32xf32>
    "tpu.trace_stop"() : () -> ()
    %41 = vector.extract_strided_slice %5 {offsets = [0, 0, 0], sizes = [1, 32, 32], strides = [1, 1, 1]} : vector<2x32x32xbf16> to vector<1x32x32xbf16>
    %42 = vector.shape_cast %41 : vector<1x32x32xbf16> to vector<32x32xbf16>
    %43 = arith.truncf %40 : vector<8x32xf32> to vector<8x32xbf16>
    %cst_18 = arith.constant dense<0.000000e+00> : vector<8x32xf32>
    %44 = tpu.matmul %43, %42, %cst_18 {dimension_numbers = #tpu.dot_dimension_numbers<[1], [0], [0], [1], [0, 0, 1, 1], [], []>} : vector<8x32xbf16>, vector<32x32xbf16>, vector<8x32xf32> -> vector<8x32xf32>
    %45 = arith.addf %7, %44 : vector<8x32xf32>
    %46 = vector.extract_strided_slice %6 {offsets = [0, 8], sizes = [8, 8], strides = [1, 1]} : vector<8x16xf32> to vector<8x8xf32>
    %47 = vector.extract_strided_slice %3 {offsets = [8, 0], sizes = [8, 8], strides = [1, 1]} : vector<80x8xf32> to vector<8x8xf32>
    %48 = vector.extract_strided_slice %3 {offsets = [48, 0], sizes = [32, 8], strides = [1, 1]} : vector<80x8xf32> to vector<32x8xf32>
    %49 = arith.mulf %46, %46 : vector<8x8xf32>
    %cst_19 = arith.constant dense<0.000000e+00> : vector<8xf32>
    %50 = vector.multi_reduction <add>, %49, %cst_19 [1] : vector<8x8xf32> to vector<8xf32>
    %51 = vector.shape_cast %50 : vector<8xf32> to vector<8x1xf32>
    %cst_20 = arith.constant 1.000000e-24 : f32
    %52 = vector.broadcast %cst_20 : f32 to vector<8x1xf32>
    %53 = arith.maximumf %51, %52 : vector<8x1xf32>
    %54 = math.rsqrt %53 : vector<8x1xf32>
    %cst_21 = arith.constant 5.000000e+00 : f32
    %55 = vector.broadcast %cst_21 : f32 to vector<8x1xf32>
    %56 = arith.mulf %55, %54 : vector<8x1xf32>
    %57 = vector.broadcast %56 : vector<8x1xf32> to vector<8x8xf32>
    %58 = arith.mulf %46, %57 : vector<8x8xf32>
    %59 = arith.mulf %47, %47 : vector<8x8xf32>
    %cst_22 = arith.constant dense<0.000000e+00> : vector<8xf32>
    %60 = vector.multi_reduction <add>, %59, %cst_22 [0] : vector<8x8xf32> to vector<8xf32>
    %61 = vector.shape_cast %60 : vector<8xf32> to vector<1x8xf32>
    %cst_23 = arith.constant 1.000000e-24 : f32
    %62 = vector.broadcast %cst_23 : f32 to vector<1x8xf32>
    %63 = arith.maximumf %61, %62 : vector<1x8xf32>
    %64 = math.rsqrt %63 : vector<1x8xf32>
    %65 = vector.broadcast %64 : vector<1x8xf32> to vector<8x8xf32>
    %66 = arith.mulf %47, %65 : vector<8x8xf32>
    %67 = arith.truncf %58 : vector<8x8xf32> to vector<8x8xbf16>
    %68 = arith.truncf %66 : vector<8x8xf32> to vector<8x8xbf16>
    %cst_24 = arith.constant dense<0.000000e+00> : vector<8x8xf32>
    %69 = tpu.matmul %67, %68, %cst_24 {dimension_numbers = #tpu.dot_dimension_numbers<[1], [0], [0], [1], [0, 0, 1, 1], [], []>} : vector<8x8xbf16>, vector<8x8xbf16>, vector<8x8xf32> -> vector<8x8xf32>
    %70 = math.exp %69 : vector<8x8xf32>
    %cst_25 = arith.constant dense<0.000000e+00> : vector<8xf32>
    %71 = vector.multi_reduction <add>, %70, %cst_25 [1] : vector<8x8xf32> to vector<8xf32>
    %72 = vector.shape_cast %71 : vector<8xf32> to vector<8x1xf32>
    %73 = tpu.reciprocal %72 : vector<8x1xf32> -> vector<8x1xf32>
    %74 = vector.broadcast %73 : vector<8x1xf32> to vector<8x8xf32>
    %75 = arith.mulf %70, %74 : vector<8x8xf32>
    %76 = arith.truncf %75 : vector<8x8xf32> to vector<8x8xbf16>
    %77 = arith.truncf %48 : vector<32x8xf32> to vector<32x8xbf16>
    "tpu.trace_start"() <{level = 10 : i32, message = "qk,dk->qd"}> : () -> ()
    %cst_26 = arith.constant dense<0.000000e+00> : vector<8x32xf32>
    %78 = tpu.matmul %76, %77, %cst_26 {dimension_numbers = #tpu.dot_dimension_numbers<[1], [1], [0], [0], [0, 0, 1, 0], [], []>} : vector<8x8xbf16>, vector<32x8xbf16>, vector<8x32xf32> -> vector<8x32xf32>
    "tpu.trace_stop"() : () -> ()
    %79 = vector.extract_strided_slice %5 {offsets = [1, 0, 0], sizes = [1, 32, 32], strides = [1, 1, 1]} : vector<2x32x32xbf16> to vector<1x32x32xbf16>
    %80 = vector.shape_cast %79 : vector<1x32x32xbf16> to vector<32x32xbf16>
    %81 = arith.truncf %78 : vector<8x32xf32> to vector<8x32xbf16>
    %cst_27 = arith.constant dense<0.000000e+00> : vector<8x32xf32>
    %82 = tpu.matmul %81, %80, %cst_27 {dimension_numbers = #tpu.dot_dimension_numbers<[1], [0], [0], [1], [0, 0, 1, 1], [], []>} : vector<8x32xbf16>, vector<32x32xbf16>, vector<8x32xf32> -> vector<8x32xf32>
    %83 = arith.addf %45, %82 : vector<8x32xf32>
    %c0_28 = arith.constant 0 : index
    %c0_29 = arith.constant 0 : index
    %84 = vector.load %arg10[%c0_28, %c0_29] : memref<1x32xf32, #tpu.memory_space<vmem>>, vector<1x32xf32>
    %85 = vector.broadcast %84 : vector<1x32xf32> to vector<8x32xf32>
    %86 = arith.addf %83, %85 : vector<8x32xf32>
    %87 = vector.extract_strided_slice %1 {offsets = [0, 16], sizes = [8, 8], strides = [1, 1]} : vector<8x24xf32> to vector<8x8xf32>
    %88 = arith.truncf %87 : vector<8x8xf32> to vector<8x8xbf16>
    %cst_30 = arith.constant dense<0.000000e+00> : vector<8x32xf32>
    %89 = tpu.matmul %88, %4, %cst_30 {dimension_numbers = #tpu.dot_dimension_numbers<[1], [0], [0], [1], [0, 0, 1, 1], [], []>} : vector<8x8xbf16>, vector<8x32xbf16>, vector<8x32xf32> -> vector<8x32xf32>
    %c0_31 = arith.constant 0 : index
    %c0_32 = arith.constant 0 : index
    %90 = vector.load %arg6[%c0_31, %c0_32] : memref<1x32xf32, #tpu.memory_space<vmem>>, vector<1x32xf32>
    %91 = vector.broadcast %90 : vector<1x32xf32> to vector<8x32xf32>
    %92 = arith.addf %89, %91 : vector<8x32xf32>
    %c0_33 = arith.constant 0 : index
    %c0_34 = arith.constant 0 : index
    %c0_35 = arith.constant 0 : index
    %c0_36 = arith.constant 0 : index
    %93 = vector.load %arg4[%c0_33, %c0_34, %c0_35, %c0_36] : memref<1x1x2x8xf32, #tpu.memory_space<vmem>>, vector<1x1x2x8xf32>
    %94 = vector.shape_cast %93 : vector<1x1x2x8xf32> to vector<2x8xf32>
    %95 = arith.truncf %94 : vector<2x8xf32> to vector<2x8xbf16>
    %cst_37 = arith.constant dense<0.000000e+00> : vector<2x32xf32>
    %96 = tpu.matmul %95, %4, %cst_37 {dimension_numbers = #tpu.dot_dimension_numbers<[1], [0], [0], [1], [0, 0, 1, 1], [], []>} : vector<2x8xbf16>, vector<8x32xbf16>, vector<2x32xf32> -> vector<2x32xf32>
    %c0_38 = arith.constant 0 : index
    %c0_39 = arith.constant 0 : index
    %97 = vector.load %arg6[%c0_38, %c0_39] : memref<1x32xf32, #tpu.memory_space<vmem>>, vector<1x32xf32>
    %98 = vector.broadcast %97 : vector<1x32xf32> to vector<2x32xf32>
    %99 = arith.addf %96, %98 : vector<2x32xf32>
    %100 = vector.extract_strided_slice %99 {offsets = [0, 0], sizes = [1, 32], strides = [1, 1]} : vector<2x32xf32> to vector<1x32xf32>
    %101 = vector.extract_strided_slice %92 {offsets = [0, 0], sizes = [7, 32], strides = [1, 1]} : vector<8x32xf32> to vector<7x32xf32>
    %102 = tpu.concatenate %100, %101 in 0 : vector<1x32xf32>, vector<7x32xf32> -> vector<8x32xf32>
    %103 = vector.extract_strided_slice %92 {offsets = [1, 0], sizes = [7, 32], strides = [1, 1]} : vector<8x32xf32> to vector<7x32xf32>
    %104 = vector.extract_strided_slice %99 {offsets = [1, 0], sizes = [1, 32], strides = [1, 1]} : vector<2x32xf32> to vector<1x32xf32>
    %105 = tpu.concatenate %103, %104 in 0 : vector<7x32xf32>, vector<1x32xf32> -> vector<8x32xf32>
    %106 = tpu.concatenate %102, %92, %105 in 1 : vector<8x32xf32>, vector<8x32xf32>, vector<8x32xf32> -> vector<8x96xf32>
    %c0_40 = arith.constant 0 : index
    %c0_41 = arith.constant 0 : index
    %107 = vector.load %arg7[%c0_40, %c0_41] : memref<96x32xbf16, #tpu.memory_space<vmem>>, vector<96x32xbf16>
    %108 = arith.truncf %106 : vector<8x96xf32> to vector<8x96xbf16>
    %cst_42 = arith.constant dense<0.000000e+00> : vector<8x32xf32>
    %109 = tpu.matmul %108, %107, %cst_42 {dimension_numbers = #tpu.dot_dimension_numbers<[1], [0], [0], [1], [0, 0, 1, 1], [], []>} : vector<8x96xbf16>, vector<96x32xbf16>, vector<8x32xf32> -> vector<8x32xf32>
    %c0_43 = arith.constant 0 : index
    %c0_44 = arith.constant 0 : index
    %110 = vector.load %arg8[%c0_43, %c0_44] : memref<1x32xf32, #tpu.memory_space<vmem>>, vector<1x32xf32>
    %111 = vector.broadcast %110 : vector<1x32xf32> to vector<8x32xf32>
    %112 = arith.addf %109, %111 : vector<8x32xf32>
    %cst_45 = arith.constant 5.000000e-01 : f32
    %113 = vector.broadcast %cst_45 : f32 to vector<8x32xf32>
    %114 = arith.mulf %113, %112 : vector<8x32xf32>
    %cst_46 = arith.constant 0.707106769 : f32
    %115 = vector.broadcast %cst_46 : f32 to vector<8x32xf32>
    %116 = arith.mulf %112, %115 : vector<8x32xf32>
    %cst_47 = arith.constant 0.000000e+00 : f32
    %117 = vector.broadcast %cst_47 : f32 to vector<8x32xf32>
    %118 = arith.cmpf olt, %116, %117 : vector<8x32xf32>
    %cst_48 = arith.constant -1.000000e+00 : f32
    %cst_49 = arith.constant 1.000000e+00 : f32
    %119 = vector.broadcast %cst_48 : f32 to vector<8x32xf32>
    %120 = vector.broadcast %cst_49 : f32 to vector<8x32xf32>
    %121 = arith.select %118, %119, %120 : vector<8x32xi1>, vector<8x32xf32>
    %122 = math.absf %116 : vector<8x32xf32>
    %cst_50 = arith.constant 0.327591091 : f32
    %123 = vector.broadcast %cst_50 : f32 to vector<8x32xf32>
    %124 = arith.mulf %123, %122 : vector<8x32xf32>
    %cst_51 = arith.constant 1.000000e+00 : f32
    %125 = vector.broadcast %cst_51 : f32 to vector<8x32xf32>
    %126 = arith.addf %125, %124 : vector<8x32xf32>
    %127 = tpu.reciprocal %126 {approx = true} : vector<8x32xf32> -> vector<8x32xf32>
    %cst_52 = arith.constant 1.06140542 : f32
    %128 = vector.broadcast %cst_52 : f32 to vector<8x32xf32>
    %129 = arith.mulf %128, %127 : vector<8x32xf32>
    %cst_53 = arith.constant -1.45315206 : f32
    %130 = vector.broadcast %cst_53 : f32 to vector<8x32xf32>
    %131 = arith.addf %129, %130 : vector<8x32xf32>
    %132 = arith.mulf %131, %127 : vector<8x32xf32>
    %cst_54 = arith.constant 1.42141378 : f32
    %133 = vector.broadcast %cst_54 : f32 to vector<8x32xf32>
    %134 = arith.addf %132, %133 : vector<8x32xf32>
    %135 = arith.mulf %134, %127 : vector<8x32xf32>
    %cst_55 = arith.constant -0.284496725 : f32
    %136 = vector.broadcast %cst_55 : f32 to vector<8x32xf32>
    %137 = arith.addf %135, %136 : vector<8x32xf32>
    %138 = arith.mulf %137, %127 : vector<8x32xf32>
    %cst_56 = arith.constant 0.254829586 : f32
    %139 = vector.broadcast %cst_56 : f32 to vector<8x32xf32>
    %140 = arith.addf %138, %139 : vector<8x32xf32>
    %141 = arith.mulf %140, %127 : vector<8x32xf32>
    %cst_57 = arith.constant 0.000000e+00 : f32
    %142 = vector.broadcast %cst_57 : f32 to vector<8x32xf32>
    %143 = arith.subf %142, %122 : vector<8x32xf32>
    %144 = arith.mulf %143, %122 : vector<8x32xf32>
    %145 = math.exp %144 : vector<8x32xf32>
    %146 = arith.mulf %141, %145 : vector<8x32xf32>
    %cst_58 = arith.constant 1.000000e+00 : f32
    %147 = vector.broadcast %cst_58 : f32 to vector<8x32xf32>
    %148 = arith.subf %147, %146 : vector<8x32xf32>
    %149 = arith.mulf %121, %148 : vector<8x32xf32>
    %cst_59 = arith.constant 1.000000e+00 : f32
    %150 = vector.broadcast %cst_59 : f32 to vector<8x32xf32>
    %151 = arith.addf %150, %149 : vector<8x32xf32>
    %152 = arith.mulf %114, %151 : vector<8x32xf32>
    %153 = arith.addf %152, %86 : vector<8x32xf32>
    %c0_60 = arith.constant 0 : index
    %c0_61 = arith.constant 0 : index
    %154 = vector.load %arg11[%c0_60, %c0_61] : memref<32x32xbf16, #tpu.memory_space<vmem>>, vector<32x32xbf16>
    %155 = arith.truncf %153 : vector<8x32xf32> to vector<8x32xbf16>
    %cst_62 = arith.constant dense<0.000000e+00> : vector<8x32xf32>
    %156 = tpu.matmul %155, %154, %cst_62 {dimension_numbers = #tpu.dot_dimension_numbers<[1], [0], [0], [1], [0, 0, 1, 1], [], []>} : vector<8x32xbf16>, vector<32x32xbf16>, vector<8x32xf32> -> vector<8x32xf32>
    %c0_63 = arith.constant 0 : index
    %c0_64 = arith.constant 0 : index
    %157 = vector.load %arg12[%c0_63, %c0_64] : memref<1x32xf32, #tpu.memory_space<vmem>>, vector<1x32xf32>
    %158 = vector.broadcast %157 : vector<1x32xf32> to vector<8x32xf32>
    %159 = arith.addf %156, %158 : vector<8x32xf32>
    %cst_65 = arith.constant 5.000000e-01 : f32
    %160 = vector.broadcast %cst_65 : f32 to vector<8x32xf32>
    %161 = arith.mulf %160, %159 : vector<8x32xf32>
    %cst_66 = arith.constant 0.707106769 : f32
    %162 = vector.broadcast %cst_66 : f32 to vector<8x32xf32>
    %163 = arith.mulf %159, %162 : vector<8x32xf32>
    %cst_67 = arith.constant 0.000000e+00 : f32
    %164 = vector.broadcast %cst_67 : f32 to vector<8x32xf32>
    %165 = arith.cmpf olt, %163, %164 : vector<8x32xf32>
    %cst_68 = arith.constant -1.000000e+00 : f32
    %cst_69 = arith.constant 1.000000e+00 : f32
    %166 = vector.broadcast %cst_68 : f32 to vector<8x32xf32>
    %167 = vector.broadcast %cst_69 : f32 to vector<8x32xf32>
    %168 = arith.select %165, %166, %167 : vector<8x32xi1>, vector<8x32xf32>
    %169 = math.absf %163 : vector<8x32xf32>
    %cst_70 = arith.constant 0.327591091 : f32
    %170 = vector.broadcast %cst_70 : f32 to vector<8x32xf32>
    %171 = arith.mulf %170, %169 : vector<8x32xf32>
    %cst_71 = arith.constant 1.000000e+00 : f32
    %172 = vector.broadcast %cst_71 : f32 to vector<8x32xf32>
    %173 = arith.addf %172, %171 : vector<8x32xf32>
    %174 = tpu.reciprocal %173 {approx = true} : vector<8x32xf32> -> vector<8x32xf32>
    %cst_72 = arith.constant 1.06140542 : f32
    %175 = vector.broadcast %cst_72 : f32 to vector<8x32xf32>
    %176 = arith.mulf %175, %174 : vector<8x32xf32>
    %cst_73 = arith.constant -1.45315206 : f32
    %177 = vector.broadcast %cst_73 : f32 to vector<8x32xf32>
    %178 = arith.addf %176, %177 : vector<8x32xf32>
    %179 = arith.mulf %178, %174 : vector<8x32xf32>
    %cst_74 = arith.constant 1.42141378 : f32
    %180 = vector.broadcast %cst_74 : f32 to vector<8x32xf32>
    %181 = arith.addf %179, %180 : vector<8x32xf32>
    %182 = arith.mulf %181, %174 : vector<8x32xf32>
    %cst_75 = arith.constant -0.284496725 : f32
    %183 = vector.broadcast %cst_75 : f32 to vector<8x32xf32>
    %184 = arith.addf %182, %183 : vector<8x32xf32>
    %185 = arith.mulf %184, %174 : vector<8x32xf32>
    %cst_76 = arith.constant 0.254829586 : f32
    %186 = vector.broadcast %cst_76 : f32 to vector<8x32xf32>
    %187 = arith.addf %185, %186 : vector<8x32xf32>
    %188 = arith.mulf %187, %174 : vector<8x32xf32>
    %cst_77 = arith.constant 0.000000e+00 : f32
    %189 = vector.broadcast %cst_77 : f32 to vector<8x32xf32>
    %190 = arith.subf %189, %169 : vector<8x32xf32>
    %191 = arith.mulf %190, %169 : vector<8x32xf32>
    %192 = math.exp %191 : vector<8x32xf32>
    %193 = arith.mulf %188, %192 : vector<8x32xf32>
    %cst_78 = arith.constant 1.000000e+00 : f32
    %194 = vector.broadcast %cst_78 : f32 to vector<8x32xf32>
    %195 = arith.subf %194, %193 : vector<8x32xf32>
    %196 = arith.mulf %168, %195 : vector<8x32xf32>
    %cst_79 = arith.constant 1.000000e+00 : f32
    %197 = vector.broadcast %cst_79 : f32 to vector<8x32xf32>
    %198 = arith.addf %197, %196 : vector<8x32xf32>
    %199 = arith.mulf %161, %198 : vector<8x32xf32>
    %200 = arith.addf %92, %199 : vector<8x32xf32>
    %c0_80 = arith.constant 0 : index
    %c0_81 = arith.constant 0 : index
    %c0_82 = arith.constant 0 : index
    %201 = vector.load %arg13[%c0_80, %c0_81, %c0_82] : memref<1x8x32xf32, #tpu.memory_space<vmem>>, vector<1x8x32xf32>
    %202 = vector.shape_cast %201 : vector<1x8x32xf32> to vector<8x32xf32>
    %203 = vector.shape_cast %200 : vector<8x32xf32> to vector<1x8x32xf32>
    tpu.vector_store %arg13[%c0_80, %c0_81, %c0_82], %203 {strides = array<i32>} : memref<1x8x32xf32, #tpu.memory_space<vmem>>, vector<1x8x32xf32>,
    return
  }
  func.func @transform_0(%arg0: i32, %arg1: i32) -> (i32, i32, i32) {
    %c0_i32 = arith.constant 0 : i32
    %c0_i32_0 = arith.constant 0 : i32
    return %arg0, %arg1, %c0_i32 : i32, i32, i32
  }
  func.func @transform_1(%arg0: i32, %arg1: i32) -> (i32, i32, i32) {
    %c0_i32 = arith.constant 0 : i32
    %c0_i32_0 = arith.constant 0 : i32
    %c0_i32_1 = arith.constant 0 : i32
    return %arg0, %c0_i32, %c0_i32_0 : i32, i32, i32
  }
  func.func @transform_2(%arg0: i32, %arg1: i32) -> (i32, i32, i32, i32) {
    %c0_i32 = arith.constant 0 : i32
    %c0_i32_0 = arith.constant 0 : i32
    %c0_i32_1 = arith.constant 0 : i32
    return %arg0, %arg1, %c0_i32, %c0_i32_0 : i32, i32, i32, i32
  }
  func.func @transform_3(%arg0: i32, %arg1: i32) -> (i32, i32) {
    %c0_i32 = arith.constant 0 : i32
    %c0_i32_0 = arith.constant 0 : i32
    %c0_i32_1 = arith.constant 0 : i32
    return %c0_i32, %c0_i32_0 : i32, i32
  }
  func.func @transform_4(%arg0: i32, %arg1: i32) -> (i32, i32) {
    %c0_i32 = arith.constant 0 : i32
    %c0_i32_0 = arith.constant 0 : i32
    %c0_i32_1 = arith.constant 0 : i32
    return %c0_i32, %c0_i32_0 : i32, i32
  }
  func.func @transform_5(%arg0: i32, %arg1: i32) -> (i32, i32) {
    %c0_i32 = arith.constant 0 : i32
    %c0_i32_0 = arith.constant 0 : i32
    %c0_i32_1 = arith.constant 0 : i32
    return %c0_i32, %c0_i32_0 : i32, i32
  }
  func.func @transform_6(%arg0: i32, %arg1: i32) -> (i32, i32) {
    %c0_i32 = arith.constant 0 : i32
    %c0_i32_0 = arith.constant 0 : i32
    %c0_i32_1 = arith.constant 0 : i32
    return %c0_i32, %c0_i32_0 : i32, i32
  }
  func.func @transform_7(%arg0: i32, %arg1: i32) -> (i32, i32, i32) {
    %c0_i32 = arith.constant 0 : i32
    %c0_i32_0 = arith.constant 0 : i32
    %c0_i32_1 = arith.constant 0 : i32
    %c0_i32_2 = arith.constant 0 : i32
    return %c0_i32, %c0_i32_0, %c0_i32_1 : i32, i32, i32
  }
  func.func @transform_8(%arg0: i32, %arg1: i32) -> (i32, i32) {
    %c0_i32 = arith.constant 0 : i32
    %c0_i32_0 = arith.constant 0 : i32
    %c0_i32_1 = arith.constant 0 : i32
    return %c0_i32, %c0_i32_0 : i32, i32
  }
  func.func @transform_9(%arg0: i32, %arg1: i32) -> (i32, i32) {
    %c0_i32 = arith.constant 0 : i32
    %c0_i32_0 = arith.constant 0 : i32
    %c0_i32_1 = arith.constant 0 : i32
    return %c0_i32, %c0_i32_0 : i32, i32
  }
  func.func @transform_10(%arg0: i32, %arg1: i32) -> (i32, i32) {
    %c0_i32 = arith.constant 0 : i32
    %c0_i32_0 = arith.constant 0 : i32
    %c0_i32_1 = arith.constant 0 : i32
    return %c0_i32, %c0_i32_0 : i32, i32
  }
  func.func @transform_11(%arg0: i32, %arg1: i32) -> (i32, i32, i32) {
    %c0_i32 = arith.constant 0 : i32
    %c0_i32_0 = arith.constant 0 : i32
    return %arg0, %arg1, %c0_i32 : i32, i32, i32
  }
}

</mosaic_0001>

<bundles_post_ra>
// kernel: tpu_custom_call.1
= control target key start
LH: loop header
LB: loop body
LE: loop exit
PB: predicated region body
PF: predicated region fallthrough
CT: control target
= control target key end

     0   :  { %s1640_s0 = inlined_call_operand.vmem [shape: f32[2,8,24], index: 0, kind: input, shape index: {}]   ;;  %s1641_s1 = inlined_call_operand.vmem [shape: f32[2,80,8], index: 1, kind: input, shape index: {}]   ;;  %s1642_s2 = inlined_call_operand.vmem [shape: f32[2,1,2,8], index: 2, kind: input, shape index: {}]   ;;  %s1643_s3 = inlined_call_operand.vmem [shape: bf16[8,32], index: 3, kind: input, shape index: {}]   ;;  %s1644_s4 = inlined_call_operand.vmem [shape: f32[1,32], index: 4, kind: input, shape index: {}]   ;;  %s1645_s5 = inlined_call_operand.vmem [shape: bf16[96,32], index: 5, kind: input, shape index: {}]   ;;  %s1646_s6 = inlined_call_operand.vmem [shape: f32[1,32], index: 6, kind: input, shape index: {}]   ;;  %s1647_s7 = inlined_call_operand.vmem [shape: bf16[2,32,32], index: 7, kind: input, shape index: {}]   ;;  %s1648_s8 = inlined_call_operand.vmem [shape: f32[1,32], index: 8, kind: input, shape index: {}]   ;;  %s1649_s9 = inlined_call_operand.vmem [shape: bf16[32,32], index: 9, kind: input, shape index: {}]   ;;  %s1650_s10 = inlined_call_operand.vmem [shape: f32[1,32], index: 10, kind: input, shape index: {}]   ;;  %s1651_s11 = inlined_call_operand.hbm [shape: f32[2,8,32], index: 11, kind: output, shape index: {}]  }
   0x1   :  { %1652 = sst [smem:[#allocation5_spill]] %s1640_s0 }
   0x2   :  { %1653 = sst [smem:[#allocation6_spill]] %s1641_s1 }
   0x3   :  { %16 = vsyncpa [#allocation3], 0 }
   0x4   :  { %18 = vsyncpa [#allocation3 + $0x1], 0  ;;  %s1415_s17 = smov 0   ;;  %s1417_s18 = smov 0  }
   0x5   :  { %s1419_s19 = smov 0   ;;  %s1421_s20 = smov 0  }
   0x6   :  { %s1423_s21 = smov 0   ;;  %s1425_s22 = smov 0  }
   0x7 LB: > { %s1098_s23 = sadd.s32 4294967295, %s1348_s22   ;;  %s1099_s24 = sadd.s32 4294967294, %s1348_s22   ;;  %s1348_s22 = sphi %s1425_s22, %s24_s22   ;;  %s1344_s21 = sphi %s1423_s21, %s1662_s21   ;;  %s1340_s20 = sphi %s1421_s20, %s1661_s20   ;;  %s1336_s19 = sphi %s1419_s19, %s1660_s19   ;;  %s1332_s18 = sphi %s1417_s18, %s1659_s18   ;;  %s1328_s17 = sphi %s1415_s17, %s1658_s17  }
   0x8   : > { %s36_s25 = sadd.s32 1, %s1344_s21  ;;  %s295_s26 = sadd.s32 1, %s1336_s19 }
   0x9   : > { %p38_p0 = scmp.ge.s32.totalorder %s36_s25, 2  ;;  %p305_p1 = scmp.ne.s32.totalorder %s1336_s19, %s1332_s18 }
   0xa   : > { %p306_p2 = scmp.eq.s32.totalorder %s1098_s23, 1  ;;  %p311_p3 = scmp.ne.s32.totalorder %s1332_s18, %s1328_s17 }
   0xb   : > { %s1664_s25 = smov (%p38_p0, %s36_s25), 0  ;;  %p312_p5 = scmp.eq.s32.totalorder %s1099_s24, 1 }
   0xc   : > { %p1455_p4 = por %p306_p2, %p305_p1  ;;  %s290_s28 = ssub.s32 %s1344_s21, %s1664_s25 }
   0xd   : > { %p1102_p6 = scmp.ge.s32.totalorder %s1348_s22, 1  ;;  %p293_p7 = scmp.eq.s32.totalorder %s290_s28, 0 }
   0xe   : > { %p1462_p8 = por %p312_p5, %p311_p3  ;;  %p382_p9 = scmp.lt.s32.totalorder %s1348_s22, 3 }
   0xf   : > { %s1468_s30 = scalar_select %p293_p7, %s1336_s19, %s295_s26  }
  0x10   : > { %p383_p10 = pnand %p1102_p6, %p382_p9 }
  0x11   : > { %p436_p11 = scmp.lt.s32.totalorder (!%p383_p10), %s1340_s20, 1  ;;  %s1656_s0 = sld [smem:[#allocation5_spill]] (!%p383_p10) }
  0x12   : > { %386 = sbr.rel (%p383_p10) target bundleno = 1310 (0x51e), region = 64  ;;  %s1350_s23 = smov (!%p383_p10), 120  }
  0x13   : > { %s1657_s1 = sld [smem:[#allocation6_spill]] (!%p383_p10)  ;;  %s1351_s14 = smov (!%p383_p10), 112  }
  0x14   : > { %s1353_s15 = smov (!%p383_p10), 64  }
  0x17   : > { %s1472_s12 = scalar_select %p436_p11, %s1340_s20, 1  ;;  %vm477_vm0 = vcmask 64512   ;;  %vm519_vm10 = vcmask 1043456  }
  0x19   : > { %s1104_s13 = sshll.u32 %s1472_s12, 3  ;;  %s1181_s24 = smul.u32 80, %s1472_s12 }
  0x1a   : > { %s442_s16 = scalar_lea.vmem %s1656_s0, %s1104_s13  ;;  %s433_s0 = sand.u32 1, %s1332_s18  }
  0x1b   : > { %v1478_v0 = vld [vmem:[%s442_s16] sm:$0xff]  ;;  %s1489_s13 = scalar_lea.vmem %s1657_s1, %s1181_s24  ;;  %s1103_s24 = sshll.u32 %s433_s0, 3 }
  0x1c   : > { %v476_v1 = vmul.f32 %v1478_v0, %v1478_v0  ;;  %v1492_v6 = vld [vmem:[%s1489_s13] sm:$0xff]  ;;  %v1498_v19 = vld [vmem:[%s1489_s13 + $0x8] sm:$0xff] }
  0x1d   : > { %v494_v8 = vmul.f32 %v1492_v6, %v1492_v6  ;;  %v602_v21 = vmul.f32 %v1498_v19, %v1498_v19 }
  0x1e   : > { %583 = vrot.lane.b32.xlu0 %v476_v1, %s1350_s23  ;;  %v478_v2 = vsel %vm477_vm0, %v476_v1, 0.0 }
  0x1f   : > { %479 = vadd.xlane.f32.xlu1 %v478_v2  ;;  %v495_v9 = vsel %vm477_vm0, %v494_v8, 0.0  ;;  %v603_v25 = vsel %vm477_vm0, %v602_v21, 0.0 }
  0x20   : > { %v496_v10 = vrot.slane %v495_v9, 4  ;;  %v604_v27 = vrot.slane %v603_v25, 4 }
  0x22   : > { %v497_v13 = vadd.f32 %v496_v10, %v495_v9  ;;  %v605_v30 = vadd.f32 %v604_v27, %v603_v25 }
  0x24   : > { %v498_v14 = vrot.slane %v497_v13, 2  ;;  %v606_v32 = vrot.slane %v605_v30, 2 }
  0x26   : > { %v499_v17 = vadd.f32 %v498_v14, %v497_v13  ;;  %v607_v35 = vadd.f32 %v606_v32, %v605_v30  ;;  %v460_v30 = vld [vmem:[%s1489_s13 + $0x18] sm:$0xff] }
  0x28   : > { %v500_v18 = vrot.slane %v499_v17, 1  ;;  %v608_v38 = vrot.slane %v607_v35, 1 }
  0x2a   : > { %v501_v23 = vadd.f32 %v500_v18, %v499_v17  ;;  %v609_v43 = vadd.f32 %v608_v38, %v607_v35  ;;  %v754_v17 = vpack.c.bf16 %v1478_v0, %v1478_v0  ;;  %v465_v18 = vld [vmem:[%s1489_s13 + $0x40] sm:$0xff] }
  0x2c   : > { %v502_v26 = vmax.f32 %v501_v23, 1e-24  ;;  %v610_v46 = vmax.f32 %v609_v43, 1e-24  ;;  %v462_v23 = vld [vmem:[%s1489_s13 + $0x28] sm:$0xff] }
  0x2e   : > { %vm509_vm7 = vweird.f32 %v502_v26  ;;  %vm617_vm11 = vweird.f32 %v610_v46 }
  0x90   : > { %v584_v3 = vpop.permute.xlu0 %583 }
  0x91   : > { %v586_v4 = vsel %vm477_vm0, %v584_v3, 0.0 }
  0x92   : > { %587 = vadd.xlane.f32.xlu0 %v586_v4  ;;  %v480_v5 = vpop.xlane.xlu1 %479 }
  0x93   : > { %v481_v7 = vmax.f32 %v480_v5, 1e-24 }
  0x95   : > { %1246 = vrsqrt.f32 %v481_v7  ;;  %vm488_vm3 = vweird.f32 %v481_v7 }
  0x9b   : > { %v1247_v15 = vpop.eup %1246 }
  0x9c   : > { %v483_v16 = vmul.f32 %v1247_v15, %v481_v7  ;;  %vm489_vm4 = vweird.f32 %v1247_v15 }
  0x9d   : > { %vm490_vm6 = vmor %vm488_vm3, %vm489_vm4 }
  0x9e   : > { %v484_v20 = vmul.f32 %v1247_v15, %v483_v16 }
  0xa0   : > { %v485_v29 = vmul.f32 0.5, %v484_v20 }
  0xa2   : > { %v486_v34 = vsub.f32 1.5, %v485_v29  ;;  %v459_v29 = vld [vmem:[%s1489_s13 + $0x10] sm:$0xff] }
  0xa4   : > { %v487_v40 = vmul.f32 %v1247_v15, %v486_v34 }
  0xa6   : > { %v491_v48 = vsel %vm490_vm6, %v1247_v15, %v487_v40 }
  0xa7   : > { %v492_v51 = vmul.f32 5.0, %v491_v48 }
  0xa9   : > { %v493_v56 = vmul.f32 %v492_v51, %v1478_v0 }
  0xab   : > { %v514_v61 = vpack.c.bf16 %v493_v56, %v493_v56 }
 0x105   : > { %v588_v11 = vpop.xlane.xlu0 %587 }
 0x106   : > { %v589_v12 = vmax.f32 %v588_v11, 1e-24 }
 0x108   : > { %1248 = vrsqrt.f32 %v589_v12  ;;  %vm596_vm2 = vweird.f32 %v589_v12 }
 0x109   : > { %1250 = vrsqrt.f32 %v502_v26 }
 0x10a   : > { %1252 = vrsqrt.f32 %v610_v46 }
 0x10e   : > { %v1249_v22 = vpop.eup %1248 }
 0x10f   : > { %v591_v24 = vmul.f32 %v1249_v22, %v589_v12  ;;  %vm597_vm1 = vweird.f32 %v1249_v22  ;;  %v1251_v37 = vpop.eup %1250 }
 0x110   : > { %vm598_vm5 = vmor %vm596_vm2, %vm597_vm1  ;;  %v504_v41 = vmul.f32 %v1251_v37, %v502_v26  ;;  %vm510_vm8 = vweird.f32 %v1251_v37  ;;  %v1253_v54 = vpop.eup %1252  ;;  %v464_v26 = vld [vmem:[%s1489_s13 + $0x38] sm:$0xff] }
 0x111   : > { %v592_v28 = vmul.f32 %v1249_v22, %v591_v24  ;;  %vm511_vm9 = vmor %vm509_vm7, %vm510_vm8  ;;  %v612_v57 = vmul.f32 %v1253_v54, %v610_v46  ;;  %vm618_vm12 = vweird.f32 %v1253_v54  ;;  %v463_v24 = vld [vmem:[%s1489_s13 + $0x30] sm:$0xff]  ;;  %vm704_vm7 = vcmask 261120  }
 0x112   : > { %v505_v44 = vmul.f32 %v1251_v37, %v504_v41  ;;  %vm619_vm13 = vmor %vm617_vm11, %vm618_vm12  ;;  %v667_v27 = vpack.c.bf16 %v464_v26, %v463_v24  ;;  %v1175_v24 = vld [vmem:[%s1645_s5 + $0x10] sm:$0xff]  ;;  %v1173_v26 = vld [vmem:[%s1645_s5] sm:$0xff]  ;;  %vm802_vm8 = vcmask 1040384  }
 0x113   : > { %v593_v31 = vmul.f32 0.5, %v592_v28  ;;  %v613_v59 = vmul.f32 %v1253_v54, %v612_v57 }
 0x114   : > { %v506_v47 = vmul.f32 0.5, %v505_v44  ;;  %v1172_v44 = vld [vmem:[%s1647_s7 + $0x18] sm:$0xff] }
 0x115   : > { %v594_v33 = vsub.f32 1.5, %v593_v31  ;;  %v614_v62 = vmul.f32 0.5, %v613_v59  ;;  %v557_v31 = vpack.c.bf16 %v460_v30, %v459_v29  ;;  %714 = vmatpush.bf16.msra.mxu0 %v1172_v44 }
 0x116   : > { %v507_v50 = vsub.f32 1.5, %v506_v47 }
 0x117   : > { %v595_v36 = vmul.f32 %v1249_v22, %v594_v33  ;;  %v615_v63 = vsub.f32 1.5, %v614_v62  ;;  %v563_v32 = vsel %vm477_vm0, %v557_v31, 0  ;;  %v467_v33 = vld [vmem:[%s1643_s3] sm:$0xf] }
 0x118   : > { %v508_v52 = vmul.f32 %v1251_v37, %v507_v50  ;;  %v766_v34 = vsel %vm519_vm10, %v467_v33, 0 }
 0x119   : > { %v599_v39 = vsel %vm598_vm5, %v1249_v22, %v595_v36  ;;  %v616_v1 = vmul.f32 %v1253_v54, %v615_v63  ;;  %v461_v22 = vld [vmem:[%s1489_s13 + $0x20] sm:$0xff] }
 0x11a   : > { %v600_v42 = vmul.f32 5.0, %v599_v39  ;;  %v512_v53 = vsel %vm511_vm9, %v1251_v37, %v508_v52  ;;  %v558_v25 = vpack.c.bf16 %v462_v23, %v461_v22  ;;  %v1177_v22 = vld [vmem:[%s1645_s5 + $0x20] sm:$0xff]  ;;  %v1176_v23 = vld [vmem:[%s1645_s5 + $0x18] sm:$0xff]  ;;  %vm819_vm9 = vcmask 523264  }
 0x11b   : > { %v513_v55 = vmul.f32 %v512_v53, %v1492_v6  ;;  %v620_v2 = vsel %vm619_vm13, %v1253_v54, %v616_v1 }
 0x11c   : > { %v601_v45 = vmul.f32 %v600_v42, %v1478_v0  ;;  %v621_v3 = vmul.f32 %v620_v2, %v1498_v19  ;;  %v466_v19 = vld [vmem:[%s1489_s13 + $0x48] sm:$0xff]  ;;  %v566_v28 = vsel %vm477_vm0, %v558_v25, 0  ;;  %v673_v0 = vsel %vm477_vm0, %v667_v27, 0  ;;  %s1106_s13 = sshll.u32 %s1472_s12, 1  ;;  %s1166_s12 = sshll.u32 %s1340_s20, 3 }
 0x11d   : > { %v515_v58 = vpack.c.bf16 %v513_v55, %v513_v55  ;;  %v668_v20 = vpack.c.bf16 %v466_v19, %v465_v18  ;;  %s454_s16 = scalar_lea.vmem %s1642_s2, %s1106_s13  ;;  %v1174_v25 = vld [vmem:[%s1645_s5 + $0x8] sm:$0xff]  ;;  %s995_s13 = scalar_lea.hbm %s1651_s11, %s1166_s12 }
 0x11e   : > { %v622_v49 = vpack.c.bf16 %v601_v45, %v601_v45  ;;  %v623_v4 = vpack.c.bf16 %v621_v3, %v621_v3  ;;  %v1170_v45 = vld [vmem:[%s1647_s7 + $0x8] sm:$0xff]  ;;  %v781_v63 = vld [vmem:[%s454_s16] sm:$0x3]  ;;  %v1171_v3 = vld [vmem:[%s1647_s7 + $0x10] sm:$0xff]  ;;  %s999_s16 = sshll.u32 %s995_s13, 4  ;;  %s984_s20 = scalar_lea.sflag [#allocation3], %s433_s0  ;;  %s1000_s16 = int_to_ptr.hbm [resolvable:$true] %s999_s16 }
 0x11f   : > { %v521_v60 = vsel %vm519_vm10, %v515_v58, 0  ;;  %v676_v21 = vsel %vm477_vm0, %v668_v20, 0  ;;  %v782_v1 = vpack.c.bf16 %v781_v63, %v781_v63  ;;  %715 = vmatpush.bf16.msra.mxu0 %v1171_v3  ;;  %v1243_v3 = vld [vmem:[%s1648_s8] ss:$0 sm:$0xff] }
 0x120   : > { %625 = vrot.lane.b32.xlu1 %v622_v49, %s1350_s23  ;;  %530 = vmatpush.bf16.msra.mxu1 %v521_v60  ;;  %v631_v5 = vsel %vm519_vm10, %v623_v4, 0  ;;  %v1169_v4 = vld [vmem:[%s1647_s7] sm:$0xff]  ;;  %vm874_vm10 = vcmask 785408   ;;  %s1284_s23 = sshra.s32 %s1000_s16, 4  ;;  %s1285_s23 = int_to_ptr.hbm [resolvable:$true] %s1284_s23 }
 0x121   : > { %640 = vmatpush.bf16.msra.mxu2 %v631_v5  ;;  %684 = vmatpush.bf16.xpose.msra.mxu3 %v676_v21  ;;  %v1178_v21 = vld [vmem:[%s1645_s5 + $0x28] sm:$0xff]  ;;  %s1286_s1 = scalar_lea.hbm %s1285_s23, 8  ;;  %p1291_p1 = scmp.lt.s32.totalorder %s1285_s23, %s1651_s11 }
 0x122   : > { %p1287_p12 = scmp.ne.s32.totalorder %s1285_s23, %s1286_s1 }
 0x123   : > { %1107 = vmatmul.msk.bf16.vlgmr.msra.gmra.mxu1 %vm477_vm0, %v514_v61  ;;  %880 = vmatpush.bf16.msrb.mxu0 %v1178_v21 }
 0x124   : > { %574 = vmatpush.bf16.xpose.msrb.mxu1 %v566_v28  ;;  %p1288_p13 = pnand %p1287_p12, %p1455_p4 }
 0x125   : > { %742 = vmatpush.bf16.msrb.mxu2 %v1170_v45 }
 0x126   : > { %p1289_p0 = pneg %p1288_p13 }
 0x127   : > { %881 = vmatpush.bf16.msrb.mxu0 %v1177_v22 }
 0x129   : > { %685 = vmatpush.bf16.xpose.msra.mxu3 %v673_v0  ;;  %743 = vmatpush.bf16.msrb.mxu2 %v1169_v4 }
 0x12b   : > { %882 = vmatpush.bf16.msrb.mxu0 %v1176_v23 }
 0x12c   : > { %575 = vmatpush.bf16.xpose.msrb.mxu1 %v563_v32 }
 0x12f   : > { %883 = vmatpush.bf16.msrb.mxu0 %v1175_v24 }
 0x131   : > { %793 = vmatpush.bf16.msrb.mxu3 %v766_v34 }
 0x133   : > { %884 = vmatpush.bf16.msrb.mxu0 %v1174_v25 }
 0x134   : > { %775 = vmatpush.bf16.msra.mxu1 %v766_v34 }
 0x137   : > { %885 = vmatpush.bf16.msrb.mxu0 %v1173_v26 }
 0x192   : > { %v626_v6 = vpop.permute.xlu1 %625 }
 0x193   : > { %1109 = vmatmul.msk.bf16.vlgmr.msra.gmra.mxu2 %vm477_vm0, %v626_v6 }
 0x1a0   : > { %v532_v7 = vpop.f32.mrf.mxu1 }
 0x1a1   : > { %v536_v11 = vmul.f32 1.442695, %v532_v7 }
 0x1a8   : > { %v534_v8 = vpop.f32.mrf.mxu1 }
 0x216   : > { %v642_v9 = vpop.f32.mrf.mxu2 }
 0x217   : > { %v646_v10 = vmul.f32 1.442695, %v642_v9 }
 0x219   : > { %1254 = vpow2.f32 %v646_v10 }
 0x21a   : > { %1256 = vpow2.f32 %v536_v11  ;;  %v1242_v11 = vld [vmem:[%s1644_s4] ss:$0 sm:$0xff] }
 0x21e   : > { %v644_v12 = vpop.f32.mrf.mxu2 }
 0x21f   : > { %v1255_v13 = vpop.eup %1254 }
 0x220   : > { %v648_v14 = vsel %vm477_vm0, %v1255_v13, 0.0  ;;  %v1513_v15 = vpop.eup %1256 }
 0x221   : > { %649 = vadd.xlane.f32.xlu2 %v648_v14  ;;  %v538_v16 = vsel %vm477_vm0, %v1513_v15, 0.0 }
 0x229   : > { %539 = vadd.xlane.f32.xlu2 %v538_v16 }
 0x241   : > { %760 = vrot.lane.b32.xlu2 %v754_v17, %s1351_s14  ;;  %s1352_s14 = smov 32  }
 0x294   : > { %v650_v35 = vpop.xlane.xlu2 %649 }
 0x295   : > { %1258 = vrcp.f32 %v650_v35  ;;  %v662_v40 = vand.u32 2147483648, %v650_v35  ;;  %v660_v42 = vand.u32 2147483647, %v650_v35  ;;  %vm656_vm15 = vweird.f32 %v650_v35 }
 0x297   : > { %v663_v47 = vor.u32 1.1754944e-38, %v662_v40  ;;  %vm661_vm2 = vcmp.eq.f32.partialorder %v660_v42, 8.507059e+37 }
 0x29b   : > { %v1259_v36 = vpop.eup %1258 }
 0x29c   : > { %v652_v37 = vmul.f32 %v1259_v36, %v650_v35  ;;  %v540_v38 = vpop.xlane.xlu2 %539  ;;  %vm657_vm14 = vweird.f32 %v1259_v36 }
 0x29d   : > { %1260 = vrcp.f32 %v540_v38  ;;  %vm658_vm1 = vmor %vm656_vm15, %vm657_vm14  ;;  %v552_v53 = vand.u32 2147483648, %v540_v38  ;;  %v550_v55 = vand.u32 2147483647, %v540_v38  ;;  %vm546_vm4 = vweird.f32 %v540_v38 }
 0x29e   : > { %v653_v39 = vsub.f32 1.0, %v652_v37 }
 0x29f   : > { %v553_v58 = vor.u32 1.1754944e-38, %v552_v53  ;;  %vm551_vm6 = vcmp.eq.f32.partialorder %v550_v55, 8.507059e+37 }
 0x2a0   : > { %v654_v41 = vmul.f32 %v1259_v36, %v653_v39 }
 0x2a2   : > { %v655_v43 = vadd.f32 %v1259_v36, %v654_v41 }
 0x2a3   : > { %v1261_v46 = vpop.eup %1260 }
 0x2a4   : > { %v542_v48 = vmul.f32 %v1261_v46, %v540_v38  ;;  %v659_v49 = vsel %vm658_vm1, %v1259_v36, %v655_v43  ;;  %vm547_vm3 = vweird.f32 %v1261_v46  ;;  %v761_v2 = vpop.permute.xlu2 %760  ;;  %v1244_v38 = vld [vmem:[%s1646_s6] ss:$0 sm:$0xff] }
 0x2a5   : > { %v664_v50 = vsel %vm661_vm2, %v663_v47, %v659_v49  ;;  %vm548_vm5 = vmor %vm546_vm4, %vm547_vm3  ;;  %v1179_v47 = vld [vmem:[%s1649_s9] sm:$0xff] }
 0x2a6   : > { %v543_v51 = vsub.f32 1.0, %v542_v48  ;;  %v665_v52 = vmul.f32 %v1255_v13, %v664_v50 }
 0x2a8   : > { %v544_v54 = vmul.f32 %v1261_v46, %v543_v51  ;;  %v666_v56 = vpack.c.bf16 %v665_v52, %v665_v52 }
 0x2aa   : > { %v545_v57 = vadd.f32 %v1261_v46, %v544_v54  ;;  %1110 = vmatmul.msk.bf16.vlgmr.msra.gmra.mxu3 %vm477_vm0, %v666_v56 }
 0x2ac   : > { %v549_v59 = vsel %vm548_vm5, %v1261_v46, %v545_v57  ;;  %v1180_v46 = vld [vmem:[%s1649_s9 + $0x8] sm:$0xff] }
 0x2ad   : > { %v554_v60 = vsel %vm551_vm6, %v553_v58, %v549_v59  ;;  %948 = vmatpush.bf16.msra.mxu2 %v1180_v46 }
 0x2ae   : > { %v555_v61 = vmul.f32 %v1513_v15, %v554_v60 }
 0x2b0   : > { %v556_v62 = vpack.c.bf16 %v555_v61, %v555_v61 }
 0x2b1   : > { %949 = vmatpush.bf16.msra.mxu2 %v1179_v47 }
 0x2b2   : > { %1108 = vmatmul.msk.bf16.vlgmr.msrb.gmra.mxu1 %vm477_vm0, %v556_v62 }
 0x2ba   : > { %1130 = vmatmul.msk.bf16.vlgmr.msrb.gmra.mxu3 %vm477_vm0, %v782_v1  ;;  %v1354_v1 = vmov 1.0  }
 0x2c2   : > { %1129 = vmatmul.msk.bf16.vlgmr.msra.gmra.mxu1 %vm477_vm0, %v761_v2  ;;  %vm809_vm0 = vcmask 1046528  }
 0x32d   : > { %v687_v5 = vpop.f32.mrf.mxu3 }
 0x32e   : > { %v691_v6 = vpack.c.bf16 %v687_v5, %v687_v5 }
 0x32f   : > { %v577_v7 = vpop.f32.mrf.mxu1 }
 0x330   : > { %v581_v8 = vpack.c.bf16 %v577_v7, %v577_v7  ;;  %1119 = vmatmul.msk.bf16.vlgmr.msra.gmra.mxu0 %vm704_vm7, %v691_v6 }
 0x332   : > { %1128 = vmatmul.msk.bf16.vlgmr.msrb.gmra.mxu2 %vm704_vm7, %v581_v8 }
 0x335   : > { %v689_v9 = vpop.f32.mrf.mxu3 }
 0x337   : > { %v579_v10 = vpop.f32.mrf.mxu1 }
 0x33d   : > { %v795_v12 = vpop.f32.mrf.mxu3 }
 0x33e   : > { %v796_v13 = vadd.f32 %v1242_v11, %v795_v12 }
 0x33f   : > { %v777_v14 = vpop.f32.mrf.mxu1 }
 0x340   : > { %v1561_v15 = vadd.f32 %v1242_v11, %v777_v14  ;;  %v807_v16 = vrot.slane %v796_v13, 2  ;;  %v1245_v11 = vld [vmem:[%s1650_s10] ss:$0 sm:$0xff] }
 0x342   : > { %811 = vrot.lane.b32.xlu1 %v1561_v15, %s1352_s14  ;;  %v804_v17 = vrot.slane %v1561_v15, 1  ;;  %v800_v28 = vrot.slane %v1561_v15, 7  ;;  %s435_s14 = scalar_lea.vmem [#allocation2], %s1103_s24  ;;  %s1290_s24 = scalar_lea.hbm %s1651_s11, 16 }
 0x343   : > { %p1292_p2 = scmp.lt.s32.totalorder %s1290_s24, %s1286_s1 }
 0x344   : > { %v810_v18 = vsel %vm809_vm0, %v804_v17, %v807_v16  ;;  %v803_v30 = vsel %vm802_vm8, %v796_v13, %v800_v28 }
 0x345   : > { %815 = vrot.lane.b32.xlu2 %v810_v18, %s1353_s15  ;;  %v797_v19 = vpop.f32.mrf.mxu3  ;;  %s997_s15 = sshll.u32 %s435_s14, 4  ;;  %p1293_p3 = por %p1292_p2, %p1291_p1  ;;  %s998_s15 = int_to_ptr.vmem [resolvable:$true] %s997_s15 }
 0x347   : > { %v779_v20 = vpop.f32.mrf.mxu1  ;;  %p1294_p5 = pnand %p1293_p3, %p1289_p0 }
 0x39f   : > { %v816_v0 = vpop.permute.xlu2 %815 }
 0x3ad   : > { %v717_v27 = vpop.f32.mrf.mxu0 }
 0x3b4   : > { %v812_v29 = vpop.permute.xlu1 %811 }
 0x3b5   : > { %v818_v31 = vsel %vm704_vm7, %v803_v30, %v812_v29  ;;  %v719_v32 = vpop.f32.mrf.mxu0  ;;  %v745_v33 = vpop.f32.mrf.mxu2 }
 0x3b6   : > { %v820_v34 = vsel %vm819_vm9, %v818_v31, %v816_v0  ;;  %v746_v35 = vadd.f32 %v745_v33, %v717_v27 }
 0x3b7   : > { %v833_v36 = vpack.c.bf16 %v820_v34, %v820_v34 }
 0x3b8   : > { %v753_v7 = vadd.f32 %v1243_v3, %v746_v35 }
 0x3b9   : > { %1155 = vmatmul.msk.bf16.vlgmr.msrb.gmra.mxu0 %vm874_vm10, %v833_v36 }
 0x3bd   : > { %v747_v37 = vpop.f32.mrf.mxu2 }
 0x436   : > { %v887_v39 = vpop.f32.mrf.mxu0 }
 0x437   : > { %v888_v40 = vadd.f32 %v1244_v38, %v887_v39 }
 0x439   : > { %v892_v41 = vmul.f32 0.70710677, %v888_v40  ;;  %v891_v5 = vmul.f32 0.5, %v888_v40 }
 0x43b   : > { %v895_v42 = vand.u32 2147483647, %v892_v41  ;;  %vm893_vm11 = vcmp.lt.f32.partialorder %v892_v41, 0.0 }
 0x43c   : > { %v894_v2 = vsel %vm893_vm11, -1.0, %v1354_v1 }
 0x43d   : > { %v896_v43 = vmul.f32 0.3275911, %v895_v42  ;;  %v908_v49 = vsub.f32 0.0, %v895_v42 }
 0x43e   : > { %v889_v44 = vpop.f32.mrf.mxu0 }
 0x43f   : > { %v897_v45 = vadd.f32 1.0, %v896_v43  ;;  %v909_v52 = vmul.f32 %v908_v49, %v895_v42 }
 0x441   : > { %1262 = vrcp.f32 %v897_v45  ;;  %v910_v55 = vmul.f32 1.442695, %v909_v52 }
 0x443   : > { %1264 = vpow2.f32 %v910_v55 }
 0x447   : > { %v1263_v48 = vpop.eup %1262 }
 0x448   : > { %v899_v50 = vmul.f32 1.0614054, %v1263_v48 }
 0x449   : > { %v1265_v61 = vpop.eup %1264 }
 0x44a   : > { %v900_v51 = vadd.f32 -1.4531521, %v899_v50 }
 0x44c   : > { %v901_v53 = vmul.f32 %v1263_v48, %v900_v51 }
 0x44e   : > { %v902_v54 = vadd.f32 1.4214138, %v901_v53 }
 0x450   : > { %v903_v56 = vmul.f32 %v1263_v48, %v902_v54 }
 0x452   : > { %v904_v57 = vadd.f32 -0.28449672, %v903_v56 }
 0x454   : > { %v905_v58 = vmul.f32 %v1263_v48, %v904_v57 }
 0x456   : > { %v906_v59 = vadd.f32 0.2548296, %v905_v58 }
 0x458   : > { %v907_v60 = vmul.f32 %v1263_v48, %v906_v59 }
 0x45a   : > { %v912_v62 = vmul.f32 %v1265_v61, %v907_v60 }
 0x45c   : > { %v913_v63 = vsub.f32 1.0, %v912_v62 }
 0x45e   : > { %v914_v4 = vmul.f32 %v913_v63, %v894_v2 }
 0x460   : > { %v915_v6 = vadd.f32 1.0, %v914_v4 }
 0x462   : > { %v916_v8 = vmul.f32 %v915_v6, %v891_v5 }
 0x464   : > { %v917_v9 = vadd.f32 %v916_v8, %v753_v7 }
 0x466   : > { %v922_v10 = vpack.c.bf16 %v917_v9, %v917_v9 }
 0x468   : > { %1164 = vmatmul.msk.bf16.vlgmr.msra.gmra.mxu2 %vm704_vm7, %v922_v10 }
 0x4eb   : > { %v951_v12 = vpop.f32.mrf.mxu2 }
 0x4ec   : > { %v952_v13 = vadd.f32 %v1245_v11, %v951_v12 }
 0x4ee   : > { %v956_v14 = vmul.f32 0.70710677, %v952_v13  ;;  %v955_v37 = vmul.f32 0.5, %v952_v13 }
 0x4f0   : > { %v959_v16 = vand.u32 2147483647, %v956_v14  ;;  %vm957_vm12 = vcmp.lt.f32.partialorder %v956_v14, 0.0 }
 0x4f1   : > { %v958_v35 = vsel %vm957_vm12, -1.0, %v1354_v1 }
 0x4f2   : > { %v960_v17 = vmul.f32 0.3275911, %v959_v16  ;;  %v972_v21 = vsub.f32 0.0, %v959_v16 }
 0x4f3   : > { %v953_v18 = vpop.f32.mrf.mxu2 }
 0x4f4   : > { %v961_v19 = vadd.f32 1.0, %v960_v17  ;;  %v973_v24 = vmul.f32 %v972_v21, %v959_v16 }
 0x4f6   : > { %1266 = vrcp.f32 %v961_v19  ;;  %v974_v27 = vmul.f32 1.442695, %v973_v24 }
 0x4f8   : > { %1268 = vpow2.f32 %v974_v27 }
 0x4fc   : > { %v1267_v20 = vpop.eup %1266 }
 0x4fd   : > { %v963_v22 = vmul.f32 1.0614054, %v1267_v20 }
 0x4fe   : > { %v1269_v32 = vpop.eup %1268 }
 0x4ff   : > { %v964_v23 = vadd.f32 -1.4531521, %v963_v22 }
 0x501   : > { %v965_v25 = vmul.f32 %v1267_v20, %v964_v23 }
 0x503   : > { %v966_v26 = vadd.f32 1.4214138, %v965_v25 }
 0x505   : > { %v967_v28 = vmul.f32 %v1267_v20, %v966_v26 }
 0x507   : > { %v968_v0 = vadd.f32 -0.28449672, %v967_v28 }
 0x509   : > { %v969_v29 = vmul.f32 %v1267_v20, %v968_v0 }
 0x50b   : > { %v970_v30 = vadd.f32 0.2548296, %v969_v29 }
 0x50d   : > { %v971_v31 = vmul.f32 %v1267_v20, %v970_v30 }
 0x50f   : > { %v976_v33 = vmul.f32 %v1269_v32, %v971_v31 }
 0x511   : > { %v977_v34 = vsub.f32 1.0, %v976_v33 }
 0x513   : > { %v978_v36 = vmul.f32 %v977_v34, %v958_v35 }
 0x515   : > { %v979_v38 = vadd.f32 1.0, %v978_v36 }
 0x517   : > { %v980_v39 = vmul.f32 %v979_v38, %v955_v37 }
 0x519   : > { %v981_v40 = vadd.f32 %v980_v39, %v1561_v15 }
 0x51b   : > { %982 = vst.msk [vmem:[%s435_s14] sm:$0xff] %vm704_vm7, %v981_v40 }
 0x51c   : > { %1297 = shalt.err (!%p1294_p5)
}
 0x51d   : > { %1182 = dma.vmem_to_hbm [thread:$0]  (%p1455_p4), %s998_s15, 128, %s1000_s16, %s984_s20  }
 0x51e PF: > { %p1188_p6 = scmp.ge.s32.totalorder %s1348_s22, 2  ;;  %s1011_s0 = sand.u32 1, %s1328_s17  }
 0x51f   : > { %s1012_s14 = scalar_lea.sflag [#allocation3], %s1011_s0 }
 0x520   : > { %p1185_p7 = pnand %p1188_p6, %p1462_p8 }
 0x522   : > { %p1186_p9 = pneg %p1185_p7 }
 0x524   : > { %1323 = dma.done.wait (%p1186_p9), %s1012_s14, 128  }
 0x525   : > { %1325 = vsyncadd (%p1186_p9), %s1012_s14, 4294967168  ;;  %s24_s22 = sadd.s32 1, %s1348_s22   ;;  %s1658_s17 = smov %s1332_s18 }
 0x526   : > { %p21_p10 = scmp.ge.s32.totalorder %s24_s22, 4   ;;  %s1659_s18 = smov %s1336_s19 }
 0x527   : > { %s1660_s19 = smov %s1468_s30  ;;  %s1661_s20 = smov %s1344_s21 }
 0x528   : > { %s1662_s21 = smov %s1664_s25  ;;  %23 = sbr.rel (!%p21_p10) target bundleno = 7 (0x7), region = 105 }
 0x52d   :  { %1018 = vsyncpa [#allocation3], 1 }
 0x52e   :  { %1020 = vsyncpa [#allocation3 + $0x1], 1 }

</bundles_post_ra>
